<compile_context>
chip_gen: v6e
topology: v6e:2x2x1
jax: 0.10.0
libtpu: 0.0.40
codegen_flags: <defaults>
</compile_context>

<pallas_src>
import functools

import jax
import jax.numpy as jnp
from jax.experimental import pallas as pl
from jax.experimental.pallas import tpu as pltpu


def _round_up(x, m):
    return ((x + m - 1) // m) * m


def _pad_rows(a, n_rows):
    pad = n_rows - a.shape[0]
    return a if pad == 0 else jnp.pad(a, ((0, pad), (0, 0)))


def _deepfm_kernel(F, E,
                   flat_ref, lin_ref, bias_ref,
                   w1_ref, b1_ref, w2_ref, b2_ref,
                   out_ref):
    """One batch tile: flat (TB, F*E), lin (TB, F), bias scalar (SMEM),
    resident MLP weights; writes sigmoid scores (TB, 1)."""
    flat = flat_ref[...]                                   # (TB, F*E) compute dtype
    flat_f32 = flat.astype(jnp.float32)                    # FM/elementwise math in f32

    # --- FactorizationMachine (reduce_sum=True) ---
    # Field-sum via E-wide static lane slices of the (TB, F*E) block (keeps the
    # data in its dense lane layout instead of a (TB, F, E) low-occupancy view).
    s = flat_f32[:, 0:E]                                   # (TB, E)
    for f in range(1, F):
        s = s + flat_f32[:, f * E:(f + 1) * E]
    square_of_sum = jnp.sum(s * s, axis=1, keepdims=True)              # (TB, 1)
    sum_of_square = jnp.sum(flat_f32 * flat_f32, axis=1, keepdims=True)  # (TB, 1)
    fm = 0.5 * (square_of_sum - sum_of_square)                          # (TB, 1)

    # --- FeaturesLinear: sum over fields + scalar bias (read from SMEM) ---
    lin = jnp.sum(lin_ref[...], axis=1, keepdims=True) + bias_ref[0, 0]  # (TB, 1)

    # --- MultiLayerPerceptron (dropout = identity at inference) ---
    h = jnp.dot(flat, w1_ref[...], preferred_element_type=jnp.float32) + b1_ref[...]
    h = jnp.maximum(h, 0.0)                                # ReLU, f32
    h = jnp.dot(h.astype(w2_ref.dtype), w2_ref[...],
                preferred_element_type=jnp.float32) + b2_ref[...]
    h = jnp.maximum(h, 0.0)                                # ReLU, f32
    mlp_sum = jnp.sum(h, axis=1, keepdims=True)            # (TB, 1)

    # --- combine + sigmoid ---
    out_ref[...] = jax.nn.sigmoid(lin + fm + mlp_sum)      # (TB, 1) f32


def deepfm_forward(x_idx, params, *, compute_dtype=jnp.float32, max_tile_rows=512):
    """x_idx: (B, F) int32 flat-table indices. Returns (B,) f32 probabilities."""
    B, F = x_idx.shape
    E = params["embed_table"].shape[1]
    d_in = F * E
    d1 = params["w1"].shape[1]
    d2 = params["w2"].shape[1]

    # Glue: embedding gathers in plain JAX. The gathered activations are passed
    # into the kernel exactly once, as the flat (B, F*E) stream.
    flat = params["embed_table"][x_idx].reshape(B, d_in).astype(compute_dtype)
    lin_emb = params["lin_table"][x_idx][..., 0]           # (B, F) f32

    # Batch tiling. 512-row tiles reach ~85% of HBM roofline; bf16 needs the
    # sublane tile to be a multiple of 16. Pad B so no in-kernel masking is
    # needed for the last tile (padded rows are zeros and sliced off below).
    sub = 16 if jnp.dtype(compute_dtype) == jnp.dtype(jnp.bfloat16) else 8
    TB = min(max_tile_rows, _round_up(B, sub))
    B_pad = _round_up(B, TB)
    n_tiles = B_pad // TB
    flat = _pad_rows(flat, B_pad)
    lin_emb = _pad_rows(lin_emb, B_pad)

    w1 = params["w1"].astype(compute_dtype)
    w2 = params["w2"].astype(compute_dtype)
    b1 = params["b1"]                                      # f32, tiny, resident
    b2 = params["b2"]
    bias = params["bias"].reshape(1, 1)                    # scalar -> SMEM

    kernel = functools.partial(_deepfm_kernel, F, E)

    # VMEM budget (double-buffered activation tiles + resident weights):
    #   2 * (TB*d_in + TB*F + TB*1) * 4B + weights  ~= a few hundred KB at TB=512,
    # comfortably under the 32 MiB limit below (and v7x's 64 MiB physical VMEM).
    out = pl.pallas_call(
        kernel,
        grid=(n_tiles,),
        in_specs=[
            # streamed per-tile activations (double-buffered by Pallas)
            pl.BlockSpec((TB, d_in), lambda i: (i, 0)),
            pl.BlockSpec((TB, F), lambda i: (i, 0)),
            # scalar bias lives in SMEM (scalar path, no VMEM tile / vld)
            pl.BlockSpec(memory_space=pltpu.MemorySpace.SMEM),
            # MLP weights: same block every iteration -> VMEM-resident
            pl.BlockSpec((d_in, d1), lambda i: (0, 0)),
            pl.BlockSpec((1, d1), lambda i: (0, 0)),
            pl.BlockSpec((d1, d2), lambda i: (0, 0)),
            pl.BlockSpec((1, d2), lambda i: (0, 0)),
        ],
        out_specs=pl.BlockSpec((TB, 1), lambda i: (i, 0)),
        out_shape=jax.ShapeDtypeStruct((B_pad, 1), jnp.float32),
        compiler_params=pltpu.CompilerParams(
            dimension_semantics=("parallel",),      # 2x on v7x dual TensorCores
            vmem_limit_bytes=32 * 1024 * 1024,      # safe on v5e/v6e/v7x
        ),
    )(flat, lin_emb, bias, w1, b1, w2, b2)
    return out[:B, 0]                                      # squeeze(1), drop padding


def deepfm_reference(x_idx, params):
    """Pure-JAX f32 reference of the PyTorch forward (dropout in eval mode)."""
    B, F = x_idx.shape
    embed_x = params["embed_table"][x_idx]
    lin = jnp.sum(params["lin_table"][x_idx][..., 0], axis=1, keepdims=True) + params["bias"][0, 0]
    s = jnp.sum(embed_x, axis=1)
    fm = 0.5 * jnp.sum(s * s - jnp.sum(embed_x * embed_x, axis=1), axis=1, keepdims=True)
    h = embed_x.reshape(B, -1)
    h = jnp.maximum(h @ params["w1"] + params["b1"], 0.0)
    h = jnp.maximum(h @ params["w2"] + params["b2"], 0.0)
    mlp_sum = jnp.sum(h, axis=1, keepdims=True)
    return jax.nn.sigmoid(lin + fm + mlp_sum)[:, 0]


def make_params(key, field_dims, embed_dim, mlp_dims):
    n_feats = sum(field_dims)
    F = len(field_dims)
    d_in = F * embed_dim
    d1, d2 = mlp_dims
    keys = jax.random.split(key, 6)
    return {
        "embed_table": 0.1 * jax.random.normal(keys[0], (n_feats, embed_dim), jnp.float32),
        "lin_table":   0.1 * jax.random.normal(keys[1], (n_feats, 1), jnp.float32),
        "bias":        jnp.zeros((1, 1), jnp.float32),
        "w1":          0.1 * jax.random.normal(keys[2], (d_in, d1), jnp.float32),
        "b1":          0.01 * jax.random.normal(keys[3], (1, d1), jnp.float32),
        "w2":          0.1 * jax.random.normal(keys[4], (d1, d2), jnp.float32),
        "b2":          0.01 * jax.random.normal(keys[5], (1, d2), jnp.float32),
    }


if __name__ == "__main__":
    # small DeepFM: 4 fields, embed_dim=16, mlp_dims=(32, 16), dropout=0.2 (identity at eval)
    field_dims = (10, 20, 30, 40)
    embed_dim = 16
    mlp_dims = (32, 16)
    B = 8
    F = len(field_dims)

    key = jax.random.PRNGKey(0)
    k_params, k_idx = jax.random.split(key)
    params = make_params(k_params, field_dims, embed_dim, mlp_dims)

    # deterministic per-field categorical indices offset into the flat table
    offsets = jnp.array((0,) + tuple(jnp.cumsum(jnp.array(field_dims))[:-1].tolist()), jnp.int32)
    raw = jax.random.randint(k_idx, (B, F), 0, jnp.array(field_dims, jnp.int32))
    x_idx = (raw + offsets[None, :]).astype(jnp.int32)     # (B, F)

    y_ref = deepfm_reference(x_idx, params)

    # f32 path (matches the PyTorch module's numerics)
    y = deepfm_forward(x_idx, params)
    jax.block_until_ready(y)
    assert y.shape == (B,)
    assert jnp.allclose(y, y_ref, atol=1e-5, rtol=1e-5), (y, y_ref)

    # bf16 activation/weight streaming path (v6e/v7x bandwidth optimization);
    # accumulation stays in f32, so the result is close to the f32 reference.
    y_bf16 = deepfm_forward(x_idx, params, compute_dtype=jnp.bfloat16)
    jax.block_until_ready(y_bf16)
    assert y_bf16.shape == (B,)
    assert jnp.allclose(y_bf16, y_ref, atol=5e-2, rtol=5e-2), (y_bf16, y_ref)

    print("KERNEL_OK")
</pallas_src>

<mosaic_0001>
module attributes {stable_mosaic.version = 11 : i64} {
  func.func @_deepfm_kernel(%arg0: i32, %arg1: memref<8x64xf32, #tpu.memory_space<vmem>>, %arg2: memref<8x4xf32, #tpu.memory_space<vmem>>, %arg3: memref<1x1xf32, #tpu.memory_space<smem>>, %arg4: memref<64x32xf32, #tpu.memory_space<vmem>>, %arg5: memref<1x32xf32, #tpu.memory_space<vmem>>, %arg6: memref<32x16xf32, #tpu.memory_space<vmem>>, %arg7: memref<1x16xf32, #tpu.memory_space<vmem>>, %arg8: memref<8x1xf32, #tpu.memory_space<vmem>>) attributes {dimension_semantics = [#tpu.dimension_semantics<parallel>], iteration_bounds = array<i64: 1>, scalar_prefetch = 0 : i64, scratch_operands = 0 : i64, tpu.core_type = #tpu.core_type<tc>, window_params = [{transform_indices = @transform_0, window_bounds = array<i64: 8, 64>}, {transform_indices = @transform_1, window_bounds = array<i64: 8, 4>}, {transform_indices = @transform_2, window_bounds = array<i64: 1, 1>}, {pipeline_mode = #tpu.pipeline_mode<synchronous>, transform_indices = @transform_3, window_bounds = array<i64: 64, 32>}, {pipeline_mode = #tpu.pipeline_mode<synchronous>, transform_indices = @transform_4, window_bounds = array<i64: 1, 32>}, {pipeline_mode = #tpu.pipeline_mode<synchronous>, transform_indices = @transform_5, window_bounds = array<i64: 32, 16>}, {pipeline_mode = #tpu.pipeline_mode<synchronous>, transform_indices = @transform_6, window_bounds = array<i64: 1, 16>}, {transform_indices = @transform_7, window_bounds = array<i64: 8, 1>}]} {
    %c0 = arith.constant 0 : index
    %c0_0 = arith.constant 0 : index
    %0 = vector.load %arg1[%c0, %c0_0] : memref<8x64xf32, #tpu.memory_space<vmem>>, vector<8x64xf32>
    %1 = vector.extract_strided_slice %0 {offsets = [0, 0], sizes = [8, 16], strides = [1, 1]} : vector<8x64xf32> to vector<8x16xf32>
    %2 = vector.extract_strided_slice %0 {offsets = [0, 16], sizes = [8, 16], strides = [1, 1]} : vector<8x64xf32> to vector<8x16xf32>
    %3 = arith.addf %1, %2 : vector<8x16xf32>
    %4 = vector.extract_strided_slice %0 {offsets = [0, 32], sizes = [8, 16], strides = [1, 1]} : vector<8x64xf32> to vector<8x16xf32>
    %5 = arith.addf %3, %4 : vector<8x16xf32>
    %6 = vector.extract_strided_slice %0 {offsets = [0, 48], sizes = [8, 16], strides = [1, 1]} : vector<8x64xf32> to vector<8x16xf32>
    %7 = arith.addf %5, %6 : vector<8x16xf32>
    %8 = arith.mulf %7, %7 : vector<8x16xf32>
    %cst = arith.constant dense<0.000000e+00> : vector<8xf32>
    %9 = vector.multi_reduction <add>, %8, %cst [1] : vector<8x16xf32> to vector<8xf32>
    %10 = vector.shape_cast %9 : vector<8xf32> to vector<8x1xf32>
    %11 = arith.mulf %0, %0 : vector<8x64xf32>
    %cst_1 = arith.constant dense<0.000000e+00> : vector<8xf32>
    %12 = vector.multi_reduction <add>, %11, %cst_1 [1] : vector<8x64xf32> to vector<8xf32>
    %13 = vector.shape_cast %12 : vector<8xf32> to vector<8x1xf32>
    %14 = arith.subf %10, %13 : vector<8x1xf32>
    %cst_2 = arith.constant 5.000000e-01 : f32
    %15 = vector.broadcast %cst_2 : f32 to vector<8x1xf32>
    %16 = arith.mulf %15, %14 : vector<8x1xf32>
    %c0_3 = arith.constant 0 : index
    %c0_4 = arith.constant 0 : index
    %17 = vector.load %arg2[%c0_3, %c0_4] : memref<8x4xf32, #tpu.memory_space<vmem>>, vector<8x4xf32>
    %cst_5 = arith.constant dense<0.000000e+00> : vector<8xf32>
    %18 = vector.multi_reduction <add>, %17, %cst_5 [1] : vector<8x4xf32> to vector<8xf32>
    %19 = vector.shape_cast %18 : vector<8xf32> to vector<8x1xf32>
    %c0_6 = arith.constant 0 : index
    %c0_7 = arith.constant 0 : index
    %20 = memref.load %arg3[%c0_6, %c0_7] : memref<1x1xf32, #tpu.memory_space<smem>>
    %21 = vector.broadcast %20 : f32 to vector<8x1xf32>
    %22 = arith.addf %19, %21 : vector<8x1xf32>
    %c0_8 = arith.constant 0 : index
    %c0_9 = arith.constant 0 : index
    %23 = vector.load %arg4[%c0_8, %c0_9] : memref<64x32xf32, #tpu.memory_space<vmem>>, vector<64x32xf32>
    %cst_10 = arith.constant dense<0.000000e+00> : vector<8x32xf32>
    %24 = tpu.matmul %0, %23, %cst_10 {dimension_numbers = #tpu.dot_dimension_numbers<[1], [0], [0], [1], [0, 0, 1, 1], [], []>} : vector<8x64xf32>, vector<64x32xf32>, vector<8x32xf32> -> vector<8x32xf32>
    %c0_11 = arith.constant 0 : index
    %c0_12 = arith.constant 0 : index
    %25 = vector.load %arg5[%c0_11, %c0_12] : memref<1x32xf32, #tpu.memory_space<vmem>>, vector<1x32xf32>
    %26 = vector.broadcast %25 : vector<1x32xf32> to vector<8x32xf32>
    %27 = arith.addf %24, %26 : vector<8x32xf32>
    %cst_13 = arith.constant 0.000000e+00 : f32
    %28 = vector.broadcast %cst_13 : f32 to vector<8x32xf32>
    %29 = arith.maximumf %27, %28 : vector<8x32xf32>
    %c0_14 = arith.constant 0 : index
    %c0_15 = arith.constant 0 : index
    %30 = vector.load %arg6[%c0_14, %c0_15] : memref<32x16xf32, #tpu.memory_space<vmem>>, vector<32x16xf32>
    %cst_16 = arith.constant dense<0.000000e+00> : vector<8x16xf32>
    %31 = tpu.matmul %29, %30, %cst_16 {dimension_numbers = #tpu.dot_dimension_numbers<[1], [0], [0], [1], [0, 0, 1, 1], [], []>} : vector<8x32xf32>, vector<32x16xf32>, vector<8x16xf32> -> vector<8x16xf32>
    %c0_17 = arith.constant 0 : index
    %c0_18 = arith.constant 0 : index
    %32 = vector.load %arg7[%c0_17, %c0_18] : memref<1x16xf32, #tpu.memory_space<vmem>>, vector<1x16xf32>
    %33 = vector.broadcast %32 : vector<1x16xf32> to vector<8x16xf32>
    %34 = arith.addf %31, %33 : vector<8x16xf32>
    %cst_19 = arith.constant 0.000000e+00 : f32
    %35 = vector.broadcast %cst_19 : f32 to vector<8x16xf32>
    %36 = arith.maximumf %34, %35 : vector<8x16xf32>
    %cst_20 = arith.constant dense<0.000000e+00> : vector<8xf32>
    %37 = vector.multi_reduction <add>, %36, %cst_20 [1] : vector<8x16xf32> to vector<8xf32>
    %38 = vector.shape_cast %37 : vector<8xf32> to vector<8x1xf32>
    %39 = arith.addf %22, %16 : vector<8x1xf32>
    %40 = arith.addf %39, %38 : vector<8x1xf32>
    %41 = arith.negf %40 : vector<8x1xf32>
    %42 = math.exp %41 : vector<8x1xf32>
    %cst_21 = arith.constant 1.000000e+00 : f32
    %43 = vector.broadcast %cst_21 : f32 to vector<8x1xf32>
    %44 = arith.addf %43, %42 : vector<8x1xf32>
    %45 = arith.divf %43, %44 : vector<8x1xf32>
    %c0_22 = arith.constant 0 : index
    %c0_23 = arith.constant 0 : index
    %46 = vector.load %arg8[%c0_22, %c0_23] : memref<8x1xf32, #tpu.memory_space<vmem>>, vector<8x1xf32>
    tpu.vector_store %arg8[%c0_22, %c0_23], %45 {strides = array<i32>} : memref<8x1xf32, #tpu.memory_space<vmem>>, vector<8x1xf32>,
    return
  }
  func.func @transform_0(%arg0: i32) -> (i32, i32) {
    %c0_i32 = arith.constant 0 : i32
    %c0_i32_0 = arith.constant 0 : i32
    return %arg0, %c0_i32 : i32, i32
  }
  func.func @transform_1(%arg0: i32) -> (i32, i32) {
    %c0_i32 = arith.constant 0 : i32
    %c0_i32_0 = arith.constant 0 : i32
    return %arg0, %c0_i32 : i32, i32
  }
  func.func @transform_2(%arg0: i32) -> (i32, i32) {
    %c0_i32 = arith.constant 0 : i32
    %c0_i32_0 = arith.constant 0 : i32
    %c0_i32_1 = arith.constant 0 : i32
    return %c0_i32, %c0_i32_0 : i32, i32
  }
  func.func @transform_3(%arg0: i32) -> (i32, i32) {
    %c0_i32 = arith.constant 0 : i32
    %c0_i32_0 = arith.constant 0 : i32
    %c0_i32_1 = arith.constant 0 : i32
    return %c0_i32, %c0_i32_0 : i32, i32
  }
  func.func @transform_4(%arg0: i32) -> (i32, i32) {
    %c0_i32 = arith.constant 0 : i32
    %c0_i32_0 = arith.constant 0 : i32
    %c0_i32_1 = arith.constant 0 : i32
    return %c0_i32, %c0_i32_0 : i32, i32
  }
  func.func @transform_5(%arg0: i32) -> (i32, i32) {
    %c0_i32 = arith.constant 0 : i32
    %c0_i32_0 = arith.constant 0 : i32
    %c0_i32_1 = arith.constant 0 : i32
    return %c0_i32, %c0_i32_0 : i32, i32
  }
  func.func @transform_6(%arg0: i32) -> (i32, i32) {
    %c0_i32 = arith.constant 0 : i32
    %c0_i32_0 = arith.constant 0 : i32
    %c0_i32_1 = arith.constant 0 : i32
    return %c0_i32, %c0_i32_0 : i32, i32
  }
  func.func @transform_7(%arg0: i32) -> (i32, i32) {
    %c0_i32 = arith.constant 0 : i32
    %c0_i32_0 = arith.constant 0 : i32
    return %arg0, %c0_i32 : i32, i32
  }
}

</mosaic_0001>

<bundles_post_ra>
// kernel: tpu_custom_call.1
= control target key start
LH: loop header
LB: loop body
LE: loop exit
PB: predicated region body
PF: predicated region fallthrough
CT: control target
= control target key end

     0   :  { %v310_v0 = vmov 0.0   ;;  %vm311_vm0 = vmmov 0   ;;  %vm47_vm1 = vcmask 523264   ;;  %s313_s26 = smov 80   ;;  %s314_s27 = smov 96   ;;  %vm42_vm2 = vcmask 130048   ;;  %s413_s3 = inlined_call_operand.vmem [shape: f32[64,32], index: 3, kind: input, shape index: {}]   ;;  %s414_s5 = inlined_call_operand.vmem [shape: f32[32,16], index: 5, kind: input, shape index: {}]   ;;  %s415_s0 = inlined_call_operand.vmem [shape: f32[8,64], index: 0, kind: input, shape index: {}]   ;;  %s416_s4 = inlined_call_operand.vmem [shape: f32[1,32], index: 4, kind: input, shape index: {}]   ;;  %s417_s1 = inlined_call_operand.vmem [shape: f32[8,4], index: 1, kind: input, shape index: {}]   ;;  %s418_s6 = inlined_call_operand.vmem [shape: f32[1,16], index: 6, kind: input, shape index: {}]   ;;  %s419_s2 = inlined_call_operand.<no memory space> [shape: f32[1,1], index: 2, kind: input, shape index: {}]   ;;  %s420_s7 = inlined_call_operand.vmem [shape: f32[8,1], index: 7, kind: output, shape index: {}]  }
   0x1   :  { %271 = vmatprep.subr.mxu0 %v310_v0  ;;  %v68_v1 = vld [vmem:[%s413_s3 + $0x38] sm:$0xff]  ;;  %v67_v2 = vld [vmem:[%s413_s3 + $0x30] sm:$0xff]  ;;  %287 = vmatprep.mubr.msk.f32.mxu0 %vm311_vm0, %v310_v0  ;;  %v66_v3 = vld [vmem:[%s413_s3 + $0x28] sm:$0xff]  ;;  %vm160_vm3 = vcmask 261120   ;;  %vm54_vm4 = vcmask 31744   ;;  %v59_v40 = vstv %s419_s2  ;;  %vm246_vm5 = vcmask 7168  }
   0x2   :  { %272 = vmatpush3.msra.mxu0 %v68_v1  ;;  %290 = vmatprep.subr.mxu1 %v310_v0  ;;  %v152_v4 = vld [vmem:[%s414_s5 + $0x18] sm:$0xff]  ;;  %v65_v5 = vld [vmem:[%s413_s3 + $0x20] sm:$0xff]  ;;  %v63_v7 = vld [vmem:[%s413_s3 + $0x10] sm:$0xff] }
   0x3   :  { %273 = vmatprep.subr.mxu0 %v310_v0  ;;  %298 = vmatprep.mubr.msk.f32.mxu1 %vm311_vm0, %v310_v0  ;;  %v64_v6 = vld [vmem:[%s413_s3 + $0x18] sm:$0xff]  ;;  %v62_v8 = vld [vmem:[%s413_s3 + $0x8] sm:$0xff]  ;;  %v61_v9 = vld [vmem:[%s413_s3] sm:$0xff] }
   0x4   :  { %274 = vmatpush3.msra.mxu0 %v67_v2  ;;  %291 = vmatpush3.msra.mxu1 %v152_v4  ;;  %v27_v10 = vld [vmem:[%s415_s0] sm:$0xff]  ;;  %v151_v11 = vld [vmem:[%s414_s5 + $0x10] sm:$0xff]  ;;  %v150_v12 = vld [vmem:[%s414_s5 + $0x8] sm:$0xff]  ;;  %s312_s0 = smov 112  }
   0x5   :  { %275 = vmatprep.subr.mxu0 %v310_v0  ;;  %292 = vmatprep.subr.mxu1 %v310_v0  ;;  %v149_v13 = vld [vmem:[%s414_s5] sm:$0xff]  ;;  %v46_v14 = vmul.f32 %v27_v10, %v27_v10 }
   0x6   :  { %276 = vmatpush3.msra.mxu0 %v66_v3  ;;  %293 = vmatpush3.msra.mxu1 %v151_v11  ;;  %v252_v21 = vld [vmem:[%s416_s4] ss:$0 sm:$0xff] }
   0x7   :  { %277 = vmatprep.subr.mxu0 %v310_v0  ;;  %294 = vmatprep.subr.mxu1 %v310_v0  ;;  %v48_v15 = vsel %vm47_vm1, %v46_v14, 0.0  ;;  %v53_v29 = vld [vmem:[%s417_s1] sm:$0xff] }
   0x8   :  { %278 = vmatpush3.msra.mxu0 %v65_v5  ;;  %295 = vmatpush3.msra.mxu1 %v150_v12  ;;  %v55_v30 = vsel %vm54_vm4, %v53_v29, 0.0  ;;  %v254_v31 = vld [vmem:[%s418_s6] ss:$0 sm:$0xff] }
   0x9   :  { %279 = vmatprep.subr.mxu0 %v310_v0  ;;  %296 = vmatprep.subr.mxu1 %v310_v0 }
   0xa   :  { %280 = vmatpush3.msra.mxu0 %v64_v6  ;;  %297 = vmatpush3.msra.mxu1 %v149_v13 }
   0xb   :  { %281 = vmatprep.subr.mxu0 %v310_v0  ;;  %29 = vrot.lane.b32.xlu0 %v27_v10, %s312_s0 }
   0xc   :  { %282 = vmatpush3.msra.mxu0 %v63_v7  ;;  %37 = vrot.lane.b32.xlu1 %v27_v10, %s313_s26 }
   0xd   :  { %283 = vmatprep.subr.mxu0 %v310_v0 }
   0xe   :  { %284 = vmatpush3.msra.mxu0 %v62_v8 }
   0xf   :  { %285 = vmatprep.subr.mxu0 %v310_v0  ;;  %33 = vrot.lane.b32.xlu0 %v27_v10, %s314_s27 }
  0x10   :  { %286 = vmatpush3.msra.mxu0 %v61_v9 }
  0x11   :  { %288 = vmatmul.mubr.msk.f32.vlgmr.msra.gmra.mxu0 %vm47_vm1, %v27_v10 }
  0x2e   :  { %49 = vadd.xlane.f32.xlu0 %v48_v15 }
  0x32   :  { %56 = vadd.xlane.f32.xlu0 %v55_v30 }
  0x7d   :  { %v30_v16 = vpop.permute.xlu0 %29 }
  0x7e   :  { %v32_v17 = vadd.f32 %v30_v16, %v27_v10  ;;  %v38_v19 = vpop.permute.xlu1 %37 }
  0x81   :  { %v34_v18 = vpop.permute.xlu0 %33 }
  0x82   :  { %v36_v20 = vadd.f32 %v34_v18, %v32_v17 }
  0x84   :  { %v40_v22 = vadd.f32 %v38_v19, %v36_v20 }
  0x86   :  { %v41_v25 = vmul.f32 %v40_v22, %v40_v22 }
  0x88   :  { %v43_v28 = vsel %vm42_vm2, %v41_v25, 0.0 }
  0x89   :  { %44 = vadd.xlane.f32.xlu1 %v43_v28 }
  0xb7   :  { %v50_v37 = vpop.xlane.xlu0 %49 }
  0xbb   :  { %v57_v41 = vpop.xlane.xlu0 %56 }
  0xbc   :  { %v60_v43 = vadd.f32 %v59_v40, %v57_v41 }
  0xd1   :  { %v144_v23 = vpop.f32.mrf.mxu0 }
  0xd2   :  { %v145_v24 = vadd.f32 %v252_v21, %v144_v23 }
  0xd3   :  { %v289_v26 = vpop.f32.mrf.mxu0 }
  0xd4   :  { %v148_v27 = vmax.f32 %v145_v24, 0.0 }
  0xd6   :  { %299 = vmatmul.mubr.msk.f32.vlgmr.msra.gmra.mxu1 %vm160_vm3, %v148_v27 }
 0x112   :  { %v45_v38 = vpop.xlane.xlu1 %44 }
 0x113   :  { %v51_v39 = vsub.f32 %v45_v38, %v50_v37 }
 0x115   :  { %v52_v42 = vmul.f32 0.5, %v51_v39 }
 0x117   :  { %v238_v44 = vadd.f32 %v60_v43, %v52_v42 }
 0x196   :  { %v230_v32 = vpop.f32.mrf.mxu1 }
 0x197   :  { %v231_v33 = vadd.f32 %v254_v31, %v230_v32 }
 0x198   :  { %v300_v34 = vpop.f32.mrf.mxu1 }
 0x199   :  { %v234_v35 = vmax.f32 %v231_v33, 0.0 }
 0x19b   :  { %v235_v36 = vsel %vm42_vm2, %v234_v35, 0.0 }
 0x19c   :  { %236 = vadd.xlane.f32.xlu1 %v235_v36 }
 0x225   :  { %v237_v45 = vpop.xlane.xlu1 %236 }
 0x226   :  { %v239_v46 = vadd.f32 %v238_v44, %v237_v45 }
 0x228   :  { %v256_v47 = vmul.f32 -1.442695, %v239_v46 }
 0x22a   :  { %306 = vpow2.f32 %v256_v47 }
 0x237   :  { %v307_v48 = vpop.eup %306 }
 0x238   :  { %v243_v49 = vadd.f32 1.0, %v307_v48 }
 0x23a   :  { %308 = vrcp.f32 %v243_v49 }
 0x247   :  { %v309_v50 = vpop.eup %308 }
 0x248   :  { %247 = vst.msk [vmem:[%s420_s7] sm:$0xff] %vm246_vm5, %v309_v50 }

</bundles_post_ra>
